<compile_context>
chip_gen: v6e
topology: v6e:2x2x1
jax: 0.10.0
libtpu: 0.0.40
codegen_flags: <defaults>
</compile_context>

<pallas_src>
import jax
import jax.numpy as jnp
from jax.experimental import pallas as pl
from jax.experimental.pallas import tpu as pltpu

_TN = 128
_LANE = 128


# ----------------------------------------------------------------------------
# Pallas kernel: Y = relu(X @ W + b)   (bf16 operands, f32 accumulate/epilogue)
# ----------------------------------------------------------------------------
def _matmul_bias_relu_kernel(x_ref, w_ref, b_ref, o_ref):
    acc = jnp.dot(x_ref[...], w_ref[...], preferred_element_type=jnp.float32)
    acc = acc + b_ref[...]
    o_ref[...] = jnp.maximum(acc, 0.0).astype(o_ref.dtype)


def _round_up(x, m):
    return ((x + m - 1) // m) * m


def _pick_tile_m(m):
    # Largest tile that still leaves >=2 M-blocks (megacore / 2 TCs on v7x).
    for tm in (1024, 512, 256):
        if m >= 2 * tm:
            return tm
    return 128


def matmul_bias_relu(x, w, b):
    """relu(x @ w + b); x:(M,K) w:(K,N) b:(N,) -> (M,N) f32."""
    M, K = x.shape
    Kw, N = w.shape
    assert K == Kw
    tm = _pick_tile_m(M)
    tn = _TN
    Mp = _round_up(M, tm)
    Kp = _round_up(K, _LANE)
    Np = _round_up(N, tn)

    xp = jnp.pad(x, ((0, Mp - M), (0, Kp - K))).astype(jnp.bfloat16)
    wp = jnp.pad(w, ((0, Kp - K), (0, Np - N))).astype(jnp.bfloat16)
    bp = jnp.pad(b, (0, Np - N)).astype(jnp.float32).reshape(1, Np)

    # Explicit VMEM budget: double-buffered bf16 X/W tiles + f32 bias/out,
    # generous headroom, capped well under the v7x 64 MiB physical VMEM.
    need = 2 * (tm * Kp * 2 + Kp * tn * 2 + tn * 4 + tm * tn * 4)
    vmem_limit = int(min(48 * 2**20, max(32 * 2**20, 3 * need)))

    out = pl.pallas_call(
        _matmul_bias_relu_kernel,
        out_shape=jax.ShapeDtypeStruct((Mp, Np), jnp.float32),
        grid_spec=pltpu.PrefetchScalarGridSpec(
            num_scalar_prefetch=0,
            grid=(Mp // tm, Np // tn),
            in_specs=[
                pl.BlockSpec((tm, Kp), lambda i, j: (i, 0)),
                pl.BlockSpec((Kp, tn), lambda i, j: (0, j)),
                pl.BlockSpec((1, tn), lambda i, j: (0, j)),
            ],
            out_specs=pl.BlockSpec((tm, tn), lambda i, j: (i, j)),
        ),
        compiler_params=pltpu.CompilerParams(
            dimension_semantics=("parallel", "parallel"),
            vmem_limit_bytes=vmem_limit),
    )(xp, wp, bp)
    return out[:M, :N]


# ----------------------------------------------------------------------------
# Sub-pixel form of ConvTranspose2d(k=3, s=2, p=1, op=1) with BN+bias folded in
# ----------------------------------------------------------------------------
def _subpixel_weight_bias(params):
    """Build the (4*Cin, 4*Cout) matrix + (4*Cout,) bias.

    Columns grouped by output parity phase (dy,dx) in order (0,0),(0,1),(1,0),
    (1,1); rows grouped by input tap (x[m,p], x[m,p+1], x[m+1,p], x[m+1,p+1]).
    Derived from  oy = 2*iy - padding + ky  (padding=1, stride=2):
      out[2m  ,2p  ] = x[m,p]W[1,1]
      out[2m  ,2p+1] = x[m,p]W[1,2] + x[m,p+1]W[1,0]
      out[2m+1,2p  ] = x[m,p]W[2,1] + x[m+1,p]W[0,1]
      out[2m+1,2p+1] = x[m,p]W[2,2] + x[m,p+1]W[2,0] + x[m+1,p]W[0,2] + x[m+1,p+1]W[0,0]
    """
    w = params["w"]                                # torch layout (Cin, Cout, 3, 3)
    cin, cout = w.shape[0], w.shape[1]
    z = jnp.zeros((cin, cout), w.dtype)
    tap = lambda ky, kx: w[:, :, ky, kx]
    cols = [
        jnp.concatenate([tap(1, 1), z,         z,         z],         0),  # (0,0)
        jnp.concatenate([tap(1, 2), tap(1, 0), z,         z],         0),  # (0,1)
        jnp.concatenate([tap(2, 1), z,         tap(0, 1), z],         0),  # (1,0)
        jnp.concatenate([tap(2, 2), tap(2, 0), tap(0, 2), tap(0, 0)], 0),  # (1,1)
    ]
    wbig = jnp.concatenate(cols, axis=1)           # (4*Cin, 4*Cout)

    # Fold eval-mode BatchNorm (running stats) + conv bias into weight/bias.
    scale = params["bn_gamma"] / jnp.sqrt(params["bn_var"] + params["bn_eps"])
    shift = params["bn_beta"] - params["bn_mean"] * scale
    scale4 = jnp.tile(scale, 4)
    bbig = jnp.tile(params["b"], 4) * scale4 + jnp.tile(shift, 4)
    return wbig * scale4[None, :], bbig


def _shifted_taps(x):
    """(N,H,W,C) -> (N,H,W,4C): [x[m,p], x[m,p+1], x[m+1,p], x[m+1,p+1]],
    zero-padded past the boundary (4 taps instead of a 9x im2col)."""
    n, h, w, _ = x.shape
    xp = jnp.pad(x, ((0, 0), (0, 1), (0, 1), (0, 0)))
    return jnp.concatenate(
        [xp[:, :h, :w, :], xp[:, :h, 1:w + 1, :],
         xp[:, 1:h + 1, :w, :], xp[:, 1:h + 1, 1:w + 1, :]], axis=-1)


def upsampler_block_forward(params, x_nchw):
    """UpsamplerBlock.forward: relu(BatchNorm(ConvTranspose2d(x))). NCHW in/out."""
    x = jnp.transpose(x_nchw, (0, 2, 3, 1))                 # NHWC (C on lanes)
    n, h, w, cin = x.shape
    cout = params["b"].shape[0]
    wbig, bbig = _subpixel_weight_bias(params)
    taps = _shifted_taps(x).reshape(n * h * w, 4 * cin)
    y = matmul_bias_relu(taps, wbig, bbig)                   # (N*H*W, 4*Cout)
    y = y.reshape(n, h, w, 2, 2, cout)                       # (..., dy, dx, C)
    y = jnp.transpose(y, (0, 1, 3, 2, 4, 5)).reshape(n, 2 * h, 2 * w, cout)
    return jnp.transpose(y, (0, 3, 1, 2))                    # back to NCHW


# ----------------------------------------------------------------------------
# Plain-XLA f32 reference (for numerical sanity) + deterministic params
# ----------------------------------------------------------------------------
def reference_forward(params, x_nchw):
    w = params["w"]                                          # (Cin, Cout, 3, 3)
    w_flip = jnp.transpose(w[:, :, ::-1, ::-1], (1, 0, 2, 3))
    y = jax.lax.conv_general_dilated(
        x_nchw, w_flip, window_strides=(1, 1), padding=((1, 2), (1, 2)),
        lhs_dilation=(2, 2), dimension_numbers=("NCHW", "OIHW", "NCHW"))
    y = y + params["b"][None, :, None, None]
    scale = params["bn_gamma"] / jnp.sqrt(params["bn_var"] + params["bn_eps"])
    shift = params["bn_beta"] - params["bn_mean"] * scale
    y = y * scale[None, :, None, None] + shift[None, :, None, None]
    return jnp.maximum(y, 0.0)


def make_params(key, cin, cout):
    k = lambda i: jax.random.fold_in(key, i)
    return {
        "w": 0.05 * jax.random.normal(k(1), (cin, cout, 3, 3), jnp.float32),
        "b": 0.05 * jax.random.normal(k(2), (cout,), jnp.float32),
        "bn_gamma": 1.0 + 0.05 * jax.random.normal(k(3), (cout,), jnp.float32),
        "bn_beta": 0.05 * jax.random.normal(k(4), (cout,), jnp.float32),
        "bn_mean": 0.05 * jax.random.normal(k(5), (cout,), jnp.float32),
        "bn_var": 1.0 + jnp.abs(0.05 * jax.random.normal(k(6), (cout,), jnp.float32)),
        "bn_eps": 1e-3,
    }


# ----------------------------------------------------------------------------
if __name__ == "__main__":
    key = jax.random.PRNGKey(0)
    batch, ninput, noutput, H, W = 2, 64, 32, 16, 16
    params = make_params(key, ninput, noutput)
    x = jax.random.normal(jax.random.fold_in(key, 100),
                          (batch, ninput, H, W), jnp.float32)

    fwd = jax.jit(upsampler_block_forward)
    y = jax.block_until_ready(fwd(params, x))
    assert y.shape == (batch, noutput, 2 * H, 2 * W)
    assert bool(jnp.all(jnp.isfinite(y)))

    # Sanity-check the fused kernel against a plain-XLA f32 reference.
    ref = jax.jit(reference_forward)(params, x)
    err = float(jnp.max(jnp.abs(y - ref)))
    tol = 0.03 * float(jnp.max(jnp.abs(ref))) + 1e-3   # loose: bf16 MXU operands
    assert err <= tol, (err, tol)

    print("KERNEL_OK")
</pallas_src>

<mosaic_0001>
module attributes {stable_mosaic.version = 11 : i64} {
  func.func @_matmul_bias_relu_kernel(%arg0: i32, %arg1: i32, %arg2: memref<256x256xbf16, #tpu.memory_space<vmem>>, %arg3: memref<256x128xbf16, #tpu.memory_space<vmem>>, %arg4: memref<1x128xf32, #tpu.memory_space<vmem>>, %arg5: memref<256x128xf32, #tpu.memory_space<vmem>>) attributes {dimension_semantics = [#tpu.dimension_semantics<parallel>, #tpu.dimension_semantics<parallel>], iteration_bounds = array<i64: 2, 1>, scalar_prefetch = 0 : i64, scratch_operands = 0 : i64, tpu.core_type = #tpu.core_type<tc>, window_params = [{transform_indices = @transform_0, window_bounds = array<i64: 256, 256>}, {transform_indices = @transform_1, window_bounds = array<i64: 256, 128>}, {transform_indices = @transform_2, window_bounds = array<i64: 1, 128>}, {transform_indices = @transform_3, window_bounds = array<i64: 256, 128>}]} {
    %c0 = arith.constant 0 : index
    %c0_0 = arith.constant 0 : index
    %0 = vector.load %arg2[%c0, %c0_0] : memref<256x256xbf16, #tpu.memory_space<vmem>>, vector<256x256xbf16>
    %c0_1 = arith.constant 0 : index
    %c0_2 = arith.constant 0 : index
    %1 = vector.load %arg3[%c0_1, %c0_2] : memref<256x128xbf16, #tpu.memory_space<vmem>>, vector<256x128xbf16>
    %cst = arith.constant dense<0.000000e+00> : vector<256x128xf32>
    %2 = tpu.matmul %0, %1, %cst {dimension_numbers = #tpu.dot_dimension_numbers<[1], [0], [0], [1], [0, 0, 1, 1], [], []>} : vector<256x256xbf16>, vector<256x128xbf16>, vector<256x128xf32> -> vector<256x128xf32>
    %c0_3 = arith.constant 0 : index
    %c0_4 = arith.constant 0 : index
    %3 = vector.load %arg4[%c0_3, %c0_4] : memref<1x128xf32, #tpu.memory_space<vmem>>, vector<1x128xf32>
    %4 = vector.broadcast %3 : vector<1x128xf32> to vector<256x128xf32>
    %5 = arith.addf %2, %4 : vector<256x128xf32>
    %cst_5 = arith.constant 0.000000e+00 : f32
    %6 = vector.broadcast %cst_5 : f32 to vector<256x128xf32>
    %7 = arith.maximumf %5, %6 : vector<256x128xf32>
    %c0_6 = arith.constant 0 : index
    %c0_7 = arith.constant 0 : index
    %8 = vector.load %arg5[%c0_6, %c0_7] : memref<256x128xf32, #tpu.memory_space<vmem>>, vector<256x128xf32>
    tpu.vector_store %arg5[%c0_6, %c0_7], %7 {strides = array<i32>} : memref<256x128xf32, #tpu.memory_space<vmem>>, vector<256x128xf32>,
    return
  }
  func.func @transform_0(%arg0: i32, %arg1: i32) -> (i32, i32) {
    %c0_i32 = arith.constant 0 : i32
    %c0_i32_0 = arith.constant 0 : i32
    return %arg0, %c0_i32 : i32, i32
  }
  func.func @transform_1(%arg0: i32, %arg1: i32) -> (i32, i32) {
    %c0_i32 = arith.constant 0 : i32
    %c0_i32_0 = arith.constant 0 : i32
    return %c0_i32, %arg1 : i32, i32
  }
  func.func @transform_2(%arg0: i32, %arg1: i32) -> (i32, i32) {
    %c0_i32 = arith.constant 0 : i32
    %c0_i32_0 = arith.constant 0 : i32
    return %c0_i32, %arg1 : i32, i32
  }
  func.func @transform_3(%arg0: i32, %arg1: i32) -> (i32, i32) {
    %c0_i32 = arith.constant 0 : i32
    return %arg0, %arg1 : i32, i32
  }
}

</mosaic_0001>

<bundles_post_ra>
// kernel: mul.9
= control target key start
LH: loop header
LB: loop body
LE: loop exit
PB: predicated region body
PF: predicated region fallthrough
CT: control target
= control target key end

     0   :  { %vm8_vm0 = vcmask 261120   ;;  %s40_s8 = smov 32   ;;  %s41_s9 = smov 64   ;;  %vm14_vm1 = vcmask 1048320   ;;  %vm20_vm2 = vcmask 785920   ;;  %vm26_vm3 = vcmask 523520   ;;  %s58_s0 = inlined_call_operand.vmem [shape: f32[4,32], index: 0, kind: input, shape index: {}]   ;;  %s59_s1 = inlined_call_operand.vmem [shape: f32[128], index: 1, kind: output, shape index: {}]  }
   0x1   :  { %v5_v0 = vld [vmem:[%s58_s0] sm:$0xf]  ;;  %s39_s0 = smov 96  }
   0x2   :  { %6 = vst [vmem:[#allocation1] sm:$0xf] %v5_v0 }
   0x9   :  { %v11_v1 = vld [vmem:[#allocation1 + $0x3] sm:$0x1]   ;;  %v23_v2 = vld [vmem:[#allocation1 + $0x1] sm:$0x1]   ;;  %v7_v3 = vld [vmem:[#allocation1] sm:$0x1]  }
   0xa   :  { %12 = vrot.lane.b32.xlu0 %v11_v1, %s39_s0  ;;  %24 = vrot.lane.b32.xlu1 %v23_v2, %s40_s8  ;;  %v17_v4 = vld [vmem:[#allocation1 + $0x2] sm:$0x1]   ;;  %9 = vst.msk [vmem:[#allocation0] sm:$0x1] %vm8_vm0, %v7_v3  }
   0xe   :  { %18 = vrot.lane.b32.xlu0 %v17_v4, %s41_s9 }
  0x7c   :  { %v13_v5 = vpop.permute.xlu0 %12   ;;  %v25_v6 = vpop.permute.xlu1 %24  }
  0x7d   :  { %15 = vst.msk [vmem:[#allocation0] sm:$0x1] %vm14_vm1, %v13_v5  }
  0x80   :  { %v19_v7 = vpop.permute.xlu0 %18  }
  0x81   :  { %21 = vst.msk [vmem:[#allocation0] sm:$0x1] %vm20_vm2, %v19_v7  }
  0x82   :  { %27 = vst.msk [vmem:[#allocation0] sm:$0x1] %vm26_vm3, %v25_v6  }
  0x89   :  { %v32_v8 = vld [vmem:[#allocation0] sm:$0x1] }
  0x8a   :  { %35 = vst [vmem:[%s59_s1] sm:$0x1] %v32_v8 }

// kernel: upsampler_block_forward.1
= control target key start
LH: loop header
LB: loop body
LE: loop exit
PB: predicated region body
PF: predicated region fallthrough
CT: control target
= control target key end

     0   :  { %s1207_s12 = smov 0   ;;  %s1209_s13 = smov 0   ;;  %s1400_s0 = inlined_call_operand.vmem [shape: bf16[512,256], index: 0, kind: input, shape index: {}]   ;;  %s1401_s1 = inlined_call_operand.vmem [shape: bf16[256,128], index: 1, kind: input, shape index: {}]   ;;  %s1402_s2 = inlined_call_operand.vmem [shape: f32[1,128], index: 2, kind: input, shape index: {}]   ;;  %s1403_s3 = inlined_call_operand.vmem [shape: f32[512,128], index: 3, kind: output, shape index: {}]  }
   0x1   :  { %s1211_s14 = smov 0  }
   0x2 LB: > { %s25_s15 = sadd.s32 1, %s1181_s13  ;;  %p889_p0 = scmp.ge.s32.totalorder %s1185_s14, 1  ;;  %s1185_s14 = sphi %s1211_s14, %s13_s14   ;;  %s1181_s13 = sphi %s1209_s13, %s1405_s13   ;;  %s1177_s12 = sphi %s1207_s12, %s1404_s12  }
   0x3   : > { %p27_p1 = scmp.ge.s32.totalorder %s25_s15, 2  ;;  %p170_p2 = scmp.lt.s32.totalorder %s1185_s14, 3 }
   0x5   : > { %s1407_s15 = smov (%p27_p1, %s25_s15), 0  ;;  %p171_p3 = pnand %p889_p0, %p170_p2 }
   0x6   : > { %s890_s18 = sshll.u32 (!%p171_p3), %s1177_s12, 5 }
   0x7   : > { %174 = sbr.rel (%p171_p3) target bundleno = 307 (0x133), region = 32  ;;  %p206_p4 = scmp.lt.s32.totalorder (!%p171_p3), %s890_s18, 63 }
   0xc   : > { %v1099_v0 = vld [vmem:[%s1401_s1 + $0x78] sm:$0xff]   ;;  %v1101_v2 = vld [vmem:[%s1401_s1 + $0x70] sm:$0xff]   ;;  %v1103_v4 = vld [vmem:[%s1401_s1 + $0x68] sm:$0xff]   ;;  %s1409_s18 = smov (!%p206_p4, %s890_s18), 63 }
   0xd   : > { %v1100_v1 = vld [vmem:[%s1401_s1 + $0x38] sm:$0xff]   ;;  %947 = vmatprep.subr.bf16.mxu0 %v1099_v0  ;;  %1059 = vmatprep.subr.bf16.mxu1 %v1099_v0  ;;  %v1102_v3 = vld [vmem:[%s1401_s1 + $0x30] sm:$0xff]   ;;  %v1104_v5 = vld [vmem:[%s1401_s1 + $0x28] sm:$0xff]   ;;  %s946_s6 = sshll.u32 %s1409_s18, 3 }
   0xe   : > { %948 = vmatpush3.bf16.msra.mxu0 %v1100_v1  ;;  %1067 = vmatpush3.bf16.msra.mxu1 %v1100_v1  ;;  %v1105_v6 = vld [vmem:[%s1401_s1 + $0x60] sm:$0xff]   ;;  %v1107_v8 = vld [vmem:[%s1401_s1 + $0x58] sm:$0xff]   ;;  %s1260_s11 = scalar_lea.vmem %s1400_s0, %s946_s6  ;;  %v1109_v10 = vld [vmem:[%s1401_s1 + $0x50] sm:$0xff]   ;;  %s1327_s8 = scalar_lea.vmem %s1403_s3, %s946_s6 }
   0xf   : > { %949 = vmatprep.subr.bf16.mxu0 %v1101_v2  ;;  %1060 = vmatprep.subr.bf16.mxu1 %v1101_v2  ;;  %v1106_v7 = vld [vmem:[%s1401_s1 + $0x20] sm:$0xff]   ;;  %v1108_v9 = vld [vmem:[%s1401_s1 + $0x18] sm:$0xff]   ;;  %v1110_v13 = vld [vmem:[%s1401_s1 + $0x10] sm:$0xff]  }
  0x10   : > { %v1117_v11 = vld [vmem:[%s1260_s11 + $0x4] ss:$8 sps:$4 sm:$0xff]   ;;  %v1115_v18 = vld [vmem:[%s1260_s11] ss:$8 sps:$4 sm:$0xff]   ;;  %v1121_v20 = vld [vmem:[%s1260_s11 + $0x14] ss:$8 sps:$4 sm:$0xff]  }
  0x11   : > { %v1120_v12 = vld [vmem:[%s1260_s11 + $0x84] ss:$8 sps:$4 sm:$0xff]   ;;  %588 = vmatprep.mubr.bf16.mxu0 %v1117_v11  ;;  %v1118_v19 = vld [vmem:[%s1260_s11 + $0x80] ss:$8 sps:$4 sm:$0xff]   ;;  %v1123_v21 = vld [vmem:[%s1260_s11 + $0x94] ss:$8 sps:$4 sm:$0xff]  }
  0x12   : > { %950 = vmatpush3.bf16.msra.mxu0 %v1102_v3  ;;  %1068 = vmatpush3.bf16.msra.mxu1 %v1102_v3  ;;  %v1111_v14 = vld [vmem:[%s1401_s1 + $0x48] sm:$0xff]   ;;  %v1113_v16 = vld [vmem:[%s1401_s1 + $0x40] sm:$0xff]   ;;  %v1125_v22 = vld [vmem:[%s1260_s11 + $0x10] ss:$8 sps:$4 sm:$0xff]  }
  0x13   : > { %951 = vmatprep.subr.bf16.mxu0 %v1103_v4  ;;  %1061 = vmatprep.subr.bf16.mxu1 %v1103_v4  ;;  %v1112_v15 = vld [vmem:[%s1401_s1 + $0x8] sm:$0xff]   ;;  %v1114_v17 = vld [vmem:[%s1401_s1] sm:$0xff]   ;;  %v1126_v23 = vld [vmem:[%s1260_s11 + $0x90] ss:$8 sps:$4 sm:$0xff]  }
  0x14   : > { %652 = vmatprep.mubr.bf16.mxu1 %v1120_v12  ;;  %v1127_v24 = vld [vmem:[%s1260_s11 + $0x24] ss:$8 sps:$4 sm:$0xff]   ;;  %v1131_v26 = vld [vmem:[%s1260_s11 + $0x20] ss:$8 sps:$4 sm:$0xff]   ;;  %v1133_v28 = vld [vmem:[%s1260_s11 + $0x34] ss:$8 sps:$4 sm:$0xff]  }
  0x15   : > { %v1129_v25 = vld [vmem:[%s1260_s11 + $0xa4] ss:$8 sps:$4 sm:$0xff]   ;;  %v1132_v27 = vld [vmem:[%s1260_s11 + $0xa0] ss:$8 sps:$4 sm:$0xff]   ;;  %v1135_v29 = vld [vmem:[%s1260_s11 + $0xb4] ss:$8 sps:$4 sm:$0xff]  }
  0x16   : > { %952 = vmatpush3.bf16.msra.mxu0 %v1104_v5  ;;  %1069 = vmatpush3.bf16.msra.mxu1 %v1104_v5  ;;  %v1137_v30 = vld [vmem:[%s1260_s11 + $0x30] ss:$8 sps:$4 sm:$0xff]   ;;  %v1139_v32 = vld [vmem:[%s1260_s11 + $0x44] ss:$8 sps:$4 sm:$0xff]   ;;  %v1143_v34 = vld [vmem:[%s1260_s11 + $0x40] ss:$8 sps:$4 sm:$0xff]  }
  0x17   : > { %953 = vmatprep.subr.bf16.mxu0 %v1105_v6  ;;  %1062 = vmatprep.subr.bf16.mxu1 %v1105_v6  ;;  %v1138_v31 = vld [vmem:[%s1260_s11 + $0xb0] ss:$8 sps:$4 sm:$0xff]   ;;  %v1141_v33 = vld [vmem:[%s1260_s11 + $0xc4] ss:$8 sps:$4 sm:$0xff]   ;;  %v1144_v35 = vld [vmem:[%s1260_s11 + $0xc0] ss:$8 sps:$4 sm:$0xff]  }
  0x18   : > { %v1145_v36 = vld [vmem:[%s1260_s11 + $0x54] ss:$8 sps:$4 sm:$0xff]   ;;  %v1149_v38 = vld [vmem:[%s1260_s11 + $0x50] ss:$8 sps:$4 sm:$0xff]   ;;  %v1151_v40 = vld [vmem:[%s1260_s11 + $0x64] ss:$8 sps:$4 sm:$0xff]  }
  0x19   : > { %v1147_v37 = vld [vmem:[%s1260_s11 + $0xd4] ss:$8 sps:$4 sm:$0xff]   ;;  %v1150_v39 = vld [vmem:[%s1260_s11 + $0xd0] ss:$8 sps:$4 sm:$0xff]   ;;  %v1153_v41 = vld [vmem:[%s1260_s11 + $0xe4] ss:$8 sps:$4 sm:$0xff]  }
  0x1a   : > { %954 = vmatpush3.bf16.msra.mxu0 %v1106_v7  ;;  %1070 = vmatpush3.bf16.msra.mxu1 %v1106_v7  ;;  %v1155_v42 = vld [vmem:[%s1260_s11 + $0x60] ss:$8 sps:$4 sm:$0xff]   ;;  %v1157_v44 = vld [vmem:[%s1260_s11 + $0x74] ss:$8 sps:$4 sm:$0xff]   ;;  %v1161_v46 = vld [vmem:[%s1260_s11 + $0x70] ss:$8 sps:$4 sm:$0xff]  }
  0x1b   : > { %955 = vmatprep.subr.bf16.mxu0 %v1107_v8  ;;  %1063 = vmatprep.subr.bf16.mxu1 %v1107_v8  ;;  %v1156_v43 = vld [vmem:[%s1260_s11 + $0xe0] ss:$8 sps:$4 sm:$0xff]   ;;  %v1159_v45 = vld [vmem:[%s1260_s11 + $0xf4] ss:$8 sps:$4 sm:$0xff]   ;;  %v1162_v47 = vld [vmem:[%s1260_s11 + $0xf0] ss:$8 sps:$4 sm:$0xff]  }
  0x1c   : > { %v1318_v50 = vld [vmem:[%s1402_s2] ss:$0 sm:$0xff] }
  0x1e   : > { %956 = vmatpush3.bf16.msra.mxu0 %v1108_v9  ;;  %1071 = vmatpush3.bf16.msra.mxu1 %v1108_v9 }
  0x1f   : > { %957 = vmatprep.subr.bf16.mxu0 %v1109_v10  ;;  %1064 = vmatprep.subr.bf16.mxu1 %v1109_v10 }
  0x22   : > { %958 = vmatpush3.bf16.msra.mxu0 %v1110_v13  ;;  %1072 = vmatpush3.bf16.msra.mxu1 %v1110_v13 }
  0x23   : > { %959 = vmatprep.subr.bf16.mxu0 %v1111_v14  ;;  %1065 = vmatprep.subr.bf16.mxu1 %v1111_v14 }
  0x26   : > { %960 = vmatpush3.bf16.msra.mxu0 %v1112_v15  ;;  %1073 = vmatpush3.bf16.msra.mxu1 %v1112_v15 }
  0x27   : > { %961 = vmatprep.subr.bf16.mxu0 %v1113_v16  ;;  %1066 = vmatprep.subr.bf16.mxu1 %v1113_v16 }
  0x2a   : > { %962 = vmatpush3.bf16.msra.mxu0 %v1114_v17  ;;  %1074 = vmatpush3.bf16.msra.mxu1 %v1114_v17 }
  0x2d   : > { %589 = vmatmul.mubr.bf16.vlgmr.msra.gmra.mxu0 %v1115_v18  ;;  %653 = vmatmul.mubr.bf16.vlgmr.msra.gmra.mxu1 %v1118_v19 }
  0x2e   : > { %596 = vmatprep.mubr.bf16.mxu0 %v1121_v20  ;;  %660 = vmatprep.mubr.bf16.mxu1 %v1123_v21 }
  0x35   : > { %597 = vmatmul.mubr.bf16.gmra.mxu0 %v1125_v22  ;;  %661 = vmatmul.mubr.bf16.gmra.mxu1 %v1126_v23 }
  0x36   : > { %604 = vmatprep.mubr.bf16.mxu0 %v1127_v24  ;;  %668 = vmatprep.mubr.bf16.mxu1 %v1129_v25 }
  0x3d   : > { %605 = vmatmul.mubr.bf16.gmra.mxu0 %v1131_v26  ;;  %669 = vmatmul.mubr.bf16.gmra.mxu1 %v1132_v27 }
  0x3e   : > { %612 = vmatprep.mubr.bf16.mxu0 %v1133_v28  ;;  %676 = vmatprep.mubr.bf16.mxu1 %v1135_v29 }
  0x45   : > { %613 = vmatmul.mubr.bf16.gmra.mxu0 %v1137_v30  ;;  %677 = vmatmul.mubr.bf16.gmra.mxu1 %v1138_v31 }
  0x46   : > { %620 = vmatprep.mubr.bf16.mxu0 %v1139_v32  ;;  %684 = vmatprep.mubr.bf16.mxu1 %v1141_v33 }
  0x4d   : > { %621 = vmatmul.mubr.bf16.gmra.mxu0 %v1143_v34  ;;  %685 = vmatmul.mubr.bf16.gmra.mxu1 %v1144_v35 }
  0x4e   : > { %628 = vmatprep.mubr.bf16.mxu0 %v1145_v36  ;;  %692 = vmatprep.mubr.bf16.mxu1 %v1147_v37 }
  0x55   : > { %629 = vmatmul.mubr.bf16.gmra.mxu0 %v1149_v38  ;;  %693 = vmatmul.mubr.bf16.gmra.mxu1 %v1150_v39 }
  0x56   : > { %636 = vmatprep.mubr.bf16.mxu0 %v1151_v40  ;;  %700 = vmatprep.mubr.bf16.mxu1 %v1153_v41 }
  0x5d   : > { %637 = vmatmul.mubr.bf16.gmra.mxu0 %v1155_v42  ;;  %701 = vmatmul.mubr.bf16.gmra.mxu1 %v1156_v43 }
  0x5e   : > { %644 = vmatprep.mubr.bf16.mxu0 %v1157_v44  ;;  %708 = vmatprep.mubr.bf16.mxu1 %v1159_v45 }
  0x65   : > { %645 = vmatmul.mubr.bf16.gmra.mxu0 %v1161_v46  ;;  %709 = vmatmul.mubr.bf16.gmra.mxu1 %v1162_v47 }
  0xed   : > { %v963_v48 = vpop.f32.mrf.mxu0  ;;  %v1011_v49 = vpop.f32.mrf.mxu1 }
  0xef   : > { %v964_v51 = vpop.f32.mrf.mxu0  ;;  %v1012_v52 = vpop.f32.mrf.mxu1 }
  0xf0   : > { %v965_v53 = vadd.f32 %v964_v51, %v963_v48  ;;  %v1013_v54 = vadd.f32 %v1012_v52, %v1011_v49 }
  0xf1   : > { %v966_v55 = vpop.f32.mrf.mxu0  ;;  %v1014_v56 = vpop.f32.mrf.mxu1 }
  0xf2   : > { %v591_v57 = vadd.f32 %v965_v53, %v1318_v50  ;;  %v655_v58 = vadd.f32 %v1013_v54, %v1318_v50 }
  0xf3   : > { %v967_v59 = vpop.f32.mrf.mxu0  ;;  %v1015_v60 = vpop.f32.mrf.mxu1 }
  0xf4   : > { %v717_v61 = vmax.f32 %v591_v57, 0.0  ;;  %v733_v62 = vmax.f32 %v655_v58, 0.0  ;;  %v968_v63 = vadd.f32 %v967_v59, %v966_v55  ;;  %v1016_v0 = vadd.f32 %v1015_v60, %v1014_v56 }
  0xf5   : > { %v969_v1 = vpop.f32.mrf.mxu0  ;;  %v1017_v2 = vpop.f32.mrf.mxu1 }
  0xf6   : > { %749 = vst [vmem:[%s1327_s8] sm:$0xff] %v717_v61  ;;  %765 = vst [vmem:[%s1327_s8 + $0x80] sm:$0xff] %v733_v62  ;;  %v594_v3 = vadd.f32 %v968_v63, %v1318_v50  ;;  %v658_v4 = vadd.f32 %v1016_v0, %v1318_v50 }
  0xf7   : > { %v970_v5 = vpop.f32.mrf.mxu0  ;;  %v1018_v6 = vpop.f32.mrf.mxu1 }
  0xf8   : > { %v718_v7 = vmax.f32 %v594_v3, 0.0  ;;  %v734_v8 = vmax.f32 %v658_v4, 0.0  ;;  %v971_v9 = vadd.f32 %v970_v5, %v969_v1  ;;  %v1019_v10 = vadd.f32 %v1018_v6, %v1017_v2 }
  0xf9   : > { %v972_v11 = vpop.f32.mrf.mxu0  ;;  %v1020_v12 = vpop.f32.mrf.mxu1 }
  0xfa   : > { %750 = vst [vmem:[%s1327_s8 + $0x8] sm:$0xff] %v718_v7  ;;  %766 = vst [vmem:[%s1327_s8 + $0x88] sm:$0xff] %v734_v8  ;;  %v599_v13 = vadd.f32 %v971_v9, %v1318_v50  ;;  %v663_v14 = vadd.f32 %v1019_v10, %v1318_v50 }
  0xfb   : > { %v973_v15 = vpop.f32.mrf.mxu0  ;;  %v1021_v16 = vpop.f32.mrf.mxu1 }
  0xfc   : > { %v719_v17 = vmax.f32 %v599_v13, 0.0  ;;  %v735_v18 = vmax.f32 %v663_v14, 0.0  ;;  %v974_v19 = vadd.f32 %v973_v15, %v972_v11  ;;  %v1022_v20 = vadd.f32 %v1021_v16, %v1020_v12 }
  0xfd   : > { %v975_v21 = vpop.f32.mrf.mxu0  ;;  %v1023_v22 = vpop.f32.mrf.mxu1 }
  0xfe   : > { %751 = vst [vmem:[%s1327_s8 + $0x10] sm:$0xff] %v719_v17  ;;  %767 = vst [vmem:[%s1327_s8 + $0x90] sm:$0xff] %v735_v18  ;;  %v602_v23 = vadd.f32 %v974_v19, %v1318_v50  ;;  %v666_v24 = vadd.f32 %v1022_v20, %v1318_v50 }
  0xff   : > { %v976_v25 = vpop.f32.mrf.mxu0  ;;  %v1024_v26 = vpop.f32.mrf.mxu1 }
 0x100   : > { %v720_v27 = vmax.f32 %v602_v23, 0.0  ;;  %v736_v28 = vmax.f32 %v666_v24, 0.0  ;;  %v977_v29 = vadd.f32 %v976_v25, %v975_v21  ;;  %v1025_v30 = vadd.f32 %v1024_v26, %v1023_v22 }
 0x101   : > { %v978_v31 = vpop.f32.mrf.mxu0  ;;  %v1026_v32 = vpop.f32.mrf.mxu1 }
 0x102   : > { %752 = vst [vmem:[%s1327_s8 + $0x18] sm:$0xff] %v720_v27  ;;  %768 = vst [vmem:[%s1327_s8 + $0x98] sm:$0xff] %v736_v28  ;;  %v607_v33 = vadd.f32 %v977_v29, %v1318_v50  ;;  %v671_v34 = vadd.f32 %v1025_v30, %v1318_v50 }
 0x103   : > { %v979_v35 = vpop.f32.mrf.mxu0  ;;  %v1027_v36 = vpop.f32.mrf.mxu1 }
 0x104   : > { %v721_v37 = vmax.f32 %v607_v33, 0.0  ;;  %v737_v38 = vmax.f32 %v671_v34, 0.0  ;;  %v980_v39 = vadd.f32 %v979_v35, %v978_v31  ;;  %v1028_v40 = vadd.f32 %v1027_v36, %v1026_v32 }
 0x105   : > { %v981_v41 = vpop.f32.mrf.mxu0  ;;  %v1029_v42 = vpop.f32.mrf.mxu1 }
 0x106   : > { %753 = vst [vmem:[%s1327_s8 + $0x20] sm:$0xff] %v721_v37  ;;  %769 = vst [vmem:[%s1327_s8 + $0xa0] sm:$0xff] %v737_v38  ;;  %v610_v43 = vadd.f32 %v980_v39, %v1318_v50  ;;  %v674_v44 = vadd.f32 %v1028_v40, %v1318_v50 }
 0x107   : > { %v982_v45 = vpop.f32.mrf.mxu0  ;;  %v1030_v46 = vpop.f32.mrf.mxu1 }
 0x108   : > { %v722_v47 = vmax.f32 %v610_v43, 0.0  ;;  %v738_v48 = vmax.f32 %v674_v44, 0.0  ;;  %v983_v49 = vadd.f32 %v982_v45, %v981_v41  ;;  %v1031_v51 = vadd.f32 %v1030_v46, %v1029_v42 }
 0x109   : > { %v984_v52 = vpop.f32.mrf.mxu0  ;;  %v1032_v53 = vpop.f32.mrf.mxu1 }
 0x10a   : > { %754 = vst [vmem:[%s1327_s8 + $0x28] sm:$0xff] %v722_v47  ;;  %770 = vst [vmem:[%s1327_s8 + $0xa8] sm:$0xff] %v738_v48  ;;  %v615_v54 = vadd.f32 %v983_v49, %v1318_v50  ;;  %v679_v55 = vadd.f32 %v1031_v51, %v1318_v50 }
 0x10b   : > { %v985_v56 = vpop.f32.mrf.mxu0  ;;  %v1033_v57 = vpop.f32.mrf.mxu1 }
 0x10c   : > { %v723_v58 = vmax.f32 %v615_v54, 0.0  ;;  %v739_v59 = vmax.f32 %v679_v55, 0.0  ;;  %v986_v60 = vadd.f32 %v985_v56, %v984_v52  ;;  %v1034_v61 = vadd.f32 %v1033_v57, %v1032_v53 }
 0x10d   : > { %v987_v62 = vpop.f32.mrf.mxu0  ;;  %v1035_v63 = vpop.f32.mrf.mxu1 }
 0x10e   : > { %755 = vst [vmem:[%s1327_s8 + $0x30] sm:$0xff] %v723_v58  ;;  %771 = vst [vmem:[%s1327_s8 + $0xb0] sm:$0xff] %v739_v59  ;;  %v618_v0 = vadd.f32 %v986_v60, %v1318_v50  ;;  %v682_v1 = vadd.f32 %v1034_v61, %v1318_v50 }
 0x10f   : > { %v988_v2 = vpop.f32.mrf.mxu0  ;;  %v1036_v3 = vpop.f32.mrf.mxu1 }
 0x110   : > { %v724_v4 = vmax.f32 %v618_v0, 0.0  ;;  %v740_v5 = vmax.f32 %v682_v1, 0.0  ;;  %v989_v6 = vadd.f32 %v988_v2, %v987_v62  ;;  %v1037_v7 = vadd.f32 %v1036_v3, %v1035_v63 }
 0x111   : > { %v990_v8 = vpop.f32.mrf.mxu0  ;;  %v1038_v9 = vpop.f32.mrf.mxu1 }
 0x112   : > { %756 = vst [vmem:[%s1327_s8 + $0x38] sm:$0xff] %v724_v4  ;;  %772 = vst [vmem:[%s1327_s8 + $0xb8] sm:$0xff] %v740_v5  ;;  %v623_v10 = vadd.f32 %v989_v6, %v1318_v50  ;;  %v687_v11 = vadd.f32 %v1037_v7, %v1318_v50 }
 0x113   : > { %v991_v12 = vpop.f32.mrf.mxu0  ;;  %v1039_v13 = vpop.f32.mrf.mxu1 }
 0x114   : > { %v725_v14 = vmax.f32 %v623_v10, 0.0  ;;  %v741_v15 = vmax.f32 %v687_v11, 0.0  ;;  %v992_v16 = vadd.f32 %v991_v12, %v990_v8  ;;  %v1040_v17 = vadd.f32 %v1039_v13, %v1038_v9 }
 0x115   : > { %v993_v18 = vpop.f32.mrf.mxu0  ;;  %v1041_v19 = vpop.f32.mrf.mxu1 }
 0x116   : > { %757 = vst [vmem:[%s1327_s8 + $0x40] sm:$0xff] %v725_v14  ;;  %773 = vst [vmem:[%s1327_s8 + $0xc0] sm:$0xff] %v741_v15  ;;  %v626_v20 = vadd.f32 %v992_v16, %v1318_v50  ;;  %v690_v21 = vadd.f32 %v1040_v17, %v1318_v50 }
 0x117   : > { %v994_v22 = vpop.f32.mrf.mxu0  ;;  %v1042_v23 = vpop.f32.mrf.mxu1 }
 0x118   : > { %v726_v24 = vmax.f32 %v626_v20, 0.0  ;;  %v742_v25 = vmax.f32 %v690_v21, 0.0  ;;  %v995_v26 = vadd.f32 %v994_v22, %v993_v18  ;;  %v1043_v27 = vadd.f32 %v1042_v23, %v1041_v19 }
 0x119   : > { %v996_v28 = vpop.f32.mrf.mxu0  ;;  %v1044_v29 = vpop.f32.mrf.mxu1 }
 0x11a   : > { %758 = vst [vmem:[%s1327_s8 + $0x48] sm:$0xff] %v726_v24  ;;  %774 = vst [vmem:[%s1327_s8 + $0xc8] sm:$0xff] %v742_v25  ;;  %v631_v30 = vadd.f32 %v995_v26, %v1318_v50  ;;  %v695_v31 = vadd.f32 %v1043_v27, %v1318_v50 }
 0x11b   : > { %v997_v32 = vpop.f32.mrf.mxu0  ;;  %v1045_v33 = vpop.f32.mrf.mxu1 }
 0x11c   : > { %v727_v34 = vmax.f32 %v631_v30, 0.0  ;;  %v743_v35 = vmax.f32 %v695_v31, 0.0  ;;  %v998_v36 = vadd.f32 %v997_v32, %v996_v28  ;;  %v1046_v37 = vadd.f32 %v1045_v33, %v1044_v29 }
 0x11d   : > { %v999_v38 = vpop.f32.mrf.mxu0  ;;  %v1047_v39 = vpop.f32.mrf.mxu1 }
 0x11e   : > { %759 = vst [vmem:[%s1327_s8 + $0x50] sm:$0xff] %v727_v34  ;;  %775 = vst [vmem:[%s1327_s8 + $0xd0] sm:$0xff] %v743_v35  ;;  %v634_v40 = vadd.f32 %v998_v36, %v1318_v50  ;;  %v698_v41 = vadd.f32 %v1046_v37, %v1318_v50 }
 0x11f   : > { %v1000_v42 = vpop.f32.mrf.mxu0  ;;  %v1048_v43 = vpop.f32.mrf.mxu1 }
 0x120   : > { %v728_v44 = vmax.f32 %v634_v40, 0.0  ;;  %v744_v45 = vmax.f32 %v698_v41, 0.0  ;;  %v1001_v46 = vadd.f32 %v1000_v42, %v999_v38  ;;  %v1049_v47 = vadd.f32 %v1048_v43, %v1047_v39 }
 0x121   : > { %v1002_v48 = vpop.f32.mrf.mxu0  ;;  %v1050_v49 = vpop.f32.mrf.mxu1 }
 0x122   : > { %760 = vst [vmem:[%s1327_s8 + $0x58] sm:$0xff] %v728_v44  ;;  %776 = vst [vmem:[%s1327_s8 + $0xd8] sm:$0xff] %v744_v45  ;;  %v639_v51 = vadd.f32 %v1001_v46, %v1318_v50  ;;  %v703_v52 = vadd.f32 %v1049_v47, %v1318_v50 }
 0x123   : > { %v1003_v53 = vpop.f32.mrf.mxu0  ;;  %v1051_v54 = vpop.f32.mrf.mxu1 }
 0x124   : > { %v729_v55 = vmax.f32 %v639_v51, 0.0  ;;  %v745_v56 = vmax.f32 %v703_v52, 0.0  ;;  %v1004_v57 = vadd.f32 %v1003_v53, %v1002_v48  ;;  %v1052_v58 = vadd.f32 %v1051_v54, %v1050_v49 }
 0x125   : > { %v1005_v59 = vpop.f32.mrf.mxu0  ;;  %v1053_v60 = vpop.f32.mrf.mxu1 }
 0x126   : > { %761 = vst [vmem:[%s1327_s8 + $0x60] sm:$0xff] %v729_v55  ;;  %777 = vst [vmem:[%s1327_s8 + $0xe0] sm:$0xff] %v745_v56  ;;  %v642_v61 = vadd.f32 %v1004_v57, %v1318_v50  ;;  %v706_v62 = vadd.f32 %v1052_v58, %v1318_v50 }
 0x127   : > { %v1006_v63 = vpop.f32.mrf.mxu0  ;;  %v1054_v0 = vpop.f32.mrf.mxu1 }
 0x128   : > { %v730_v1 = vmax.f32 %v642_v61, 0.0  ;;  %v746_v2 = vmax.f32 %v706_v62, 0.0  ;;  %v1007_v3 = vadd.f32 %v1006_v63, %v1005_v59  ;;  %v1055_v4 = vadd.f32 %v1054_v0, %v1053_v60 }
 0x129   : > { %v1008_v5 = vpop.f32.mrf.mxu0  ;;  %v1056_v6 = vpop.f32.mrf.mxu1 }
 0x12a   : > { %762 = vst [vmem:[%s1327_s8 + $0x68] sm:$0xff] %v730_v1  ;;  %778 = vst [vmem:[%s1327_s8 + $0xe8] sm:$0xff] %v746_v2  ;;  %v647_v7 = vadd.f32 %v1007_v3, %v1318_v50  ;;  %v711_v8 = vadd.f32 %v1055_v4, %v1318_v50 }
 0x12b   : > { %v1009_v9 = vpop.f32.mrf.mxu0  ;;  %v1057_v10 = vpop.f32.mrf.mxu1 }
 0x12c   : > { %v731_v11 = vmax.f32 %v647_v7, 0.0  ;;  %v747_v12 = vmax.f32 %v711_v8, 0.0  ;;  %v1010_v13 = vadd.f32 %v1009_v9, %v1008_v5  ;;  %v1058_v14 = vadd.f32 %v1057_v10, %v1056_v6 }
 0x12e   : > { %763 = vst [vmem:[%s1327_s8 + $0x70] sm:$0xff] %v731_v11  ;;  %779 = vst [vmem:[%s1327_s8 + $0xf0] sm:$0xff] %v747_v12  ;;  %v650_v15 = vadd.f32 %v1010_v13, %v1318_v50  ;;  %v714_v16 = vadd.f32 %v1058_v14, %v1318_v50 }
 0x130   : > { %v732_v17 = vmax.f32 %v650_v15, 0.0  ;;  %v748_v18 = vmax.f32 %v714_v16, 0.0 }
 0x132   : > { %764 = vst [vmem:[%s1327_s8 + $0x78] sm:$0xff] %v732_v17  ;;  %780 = vst [vmem:[%s1327_s8 + $0xf8] sm:$0xff] %v748_v18 }
 0x133 PF: > { %s13_s14 = sadd.s32 1, %s1185_s14   ;;  %s1404_s12 = smov %s1181_s13 }
 0x134   : > { %p10_p5 = scmp.ge.s32.totalorder %s13_s14, 4   ;;  %s1405_s13 = smov %s1407_s15 }
 0x136   :  { %12 = sbr.rel (!%p10_p5) target bundleno = 2 (0x2), region = 68 }

</bundles_post_ra>
